<compile_context>
chip_gen: v7x
topology: tpu7x:2x2x1
jax: 0.10.0
libtpu: 0.0.40
codegen_flags: <defaults>
</compile_context>

<pallas_src>
import functools

import jax
import jax.numpy as jnp
from jax import lax
from jax.experimental import pallas as pl
from jax.experimental.pallas import tpu as pltpu

_LANE = 128
_SUB = 8
_MAX_CHUNK_ROWS = 1024      # 1024 x 128 x 4 B = 512 KiB per streamed block
_NCORES = 2                 # v7x megacore split; plain outer loop on v5e/v6e


def _round_up(x, m):
    return (x + m - 1) // m * m


def _fused_loss_kernel(scale_x, scale_z0, scale_t, scale_y,
                       total_rows, chunk_rows,
                       xn_ref, xp_ref, x0_ref, x0r_ref,
                       zn_ref, zp_ref, yn_ref, yp_ref, z0_ref,
                       o_ref, acc_ref):
    """Fused CustomizedLoss forward.

    Grid = (core split, chunk-within-split).  acc_ref is a small (8, 128) f32
    VMEM accumulator per core; all cross-lane reductions, the small z0/Z/Y/x0
    terms and the scale factors are applied once in the per-core epilogue.
    """
    c = pl.program_id(0)
    j = pl.program_id(1)
    nj = pl.num_programs(1)
    chunk_idx = c * nj + j

    @pl.when(j == 0)
    def _init():
        acc_ref[...] = jnp.zeros_like(acc_ref)

    # Steady state: lane-dense element-wise squared-diff accumulate (VPU only).
    dx = xn_ref[...].astype(jnp.float32) - xp_ref[...].astype(jnp.float32)
    sq = dx * dx

    # Mask rows past the true extent (ragged last chunk, or the clamped
    # duplicate chunk read by the idle half when the chunk count is odd / < 2).
    rows_valid = total_rows - chunk_idx * chunk_rows
    row_ids = lax.broadcasted_iota(jnp.int32, (chunk_rows, 1), 0)
    sq = jnp.where(row_ids < rows_valid, sq, 0.0)

    # Fold sublane groups into the small accumulator (free reshape, VPU adds).
    acc_ref[...] += jnp.sum(sq.reshape(chunk_rows // _SUB, _SUB, _LANE), axis=0)

    @pl.when(j == nj - 1)
    def _epilogue():
        partial = jnp.float32(scale_x) * jnp.sum(acc_ref[...])
        # Small terms are tiny; compute on every core, only core 0 contributes.
        d0 = x0_ref[...].astype(jnp.float32) - x0r_ref[...].astype(jnp.float32)
        dz = zn_ref[...].astype(jnp.float32) - zp_ref[...].astype(jnp.float32)
        dy = yn_ref[...].astype(jnp.float32) - yp_ref[...].astype(jnp.float32)
        z0v = z0_ref[...].astype(jnp.float32)
        small = (jnp.float32(scale_x) * jnp.sum(d0 * d0)
                 + jnp.float32(scale_z0) * jnp.sum(z0v * z0v)
                 + jnp.float32(scale_t) * jnp.sum(dz * dz)
                 + jnp.float32(scale_y) * jnp.sum(dy * dy))
        total = partial + jnp.where(c == 0, small, jnp.float32(0.0))
        o_ref[...] = jnp.zeros_like(o_ref) + total   # lane-dense partial block


def _rows_view(x):
    """Flatten to a lane-dense (rows, 128) view with rows a multiple of 8.

    Free contiguous reshape; a zero pad is materialized only if the element
    count is not a multiple of 8*128 (zeros cancel in squared differences since
    both operands of every difference go through this same path).
    """
    n = x.size
    flat = x.reshape(n)
    pad = _round_up(n, _SUB * _LANE) - n
    if pad:
        # TODO(synk): replace with in-kernel lane masking of the ragged tail to
        # avoid this full-array HBM copy on the dominant streams.
        flat = jnp.pad(flat, (0, pad))
    return flat.reshape(-1, _LANE)


def customized_loss(pred, lambda_flux_loss, lambda_bhp_loss,
                    lambda_trans_loss, lambda_yobs_loss):
    """Matches CustomizedLoss.forward.

    pred = (X_next_pred, X_next, Z_next_pred, Z_next,
            Yobs_pred, Yobs, z0, x0, x0_rec)
    X_next*: [T, B, C, H, W]; Z_next*: [T, B, Dz]; Yobs*: [T, B, Dy];
    z0: [B, Dz]; x0, x0_rec: [B, C, H, W].
    """
    (X_next_pred, X_next, Z_next_pred, Z_next,
     Yobs_pred, Yobs, z0, x0, x0_rec) = pred

    B = x0.shape[0]
    v = 0.1

    # Lane-dense streamed views of the big image sequences (free reshape).
    xn = _rows_view(X_next)
    xp = _rows_view(X_next_pred)
    assert xn.shape == xp.shape
    R = xn.shape[0]                       # multiple of 8 by construction

    # Resident views of the small operands.
    x0_2 = _rows_view(x0)
    x0r_2 = _rows_view(x0_rec)
    zn2 = Z_next.reshape(-1, Z_next.shape[-1])
    zp2 = Z_next_pred.reshape(-1, Z_next_pred.shape[-1])
    yn2 = Yobs.reshape(-1, Yobs.shape[-1])
    yp2 = Yobs_pred.reshape(-1, Yobs_pred.shape[-1])

    # Chunking: fixed-size row chunks, decoupled from B*C*H*W, split per core.
    chunk_rows = min(_MAX_CHUNK_ROWS, R)
    num_chunks = pl.cdiv(R, chunk_rows)
    nj = pl.cdiv(num_chunks, _NCORES)
    last_chunk = num_chunks - 1

    def stream_map(c, j):
        # Clamp so the DMA window is always in bounds; the duplicated chunk on
        # the idle half is fully masked inside the kernel.
        return (jnp.minimum(c * nj + j, last_chunk), 0)

    # Static scale factors.  flux / bhp terms are identically 0 in the
    # reference forward; lambda_flux / lambda_bhp never reach total_loss.
    scale_x = 1.0 / (2.0 * v * B)                 # loss_rec_t + loss_rec_t1
    scale_z0 = 0.5 / B                            # get_l2_reg_loss(z0)
    scale_t = float(lambda_trans_loss) * 0.5 / B  # transition loss
    scale_y = float(lambda_yobs_loss) * 0.5 / B   # observation loss

    kernel = functools.partial(_fused_loss_kernel,
                               scale_x, scale_z0, scale_t, scale_y,
                               R, chunk_rows)

    out = pl.pallas_call(
        kernel,
        out_shape=jax.ShapeDtypeStruct((_NCORES * _SUB, _LANE), jnp.float32),
        grid=(_NCORES, nj),
        in_specs=[
            pl.BlockSpec((chunk_rows, _LANE), stream_map),        # X_next rows
            pl.BlockSpec((chunk_rows, _LANE), stream_map),        # X_next_pred
            pl.BlockSpec(x0_2.shape, lambda c, j: (0, 0)),        # x0 (resident)
            pl.BlockSpec(x0r_2.shape, lambda c, j: (0, 0)),       # x0_rec
            pl.BlockSpec(zn2.shape, lambda c, j: (0, 0)),         # Z_next
            pl.BlockSpec(zp2.shape, lambda c, j: (0, 0)),         # Z_next_pred
            pl.BlockSpec(yn2.shape, lambda c, j: (0, 0)),         # Yobs
            pl.BlockSpec(yp2.shape, lambda c, j: (0, 0)),         # Yobs_pred
            pl.BlockSpec(z0.shape, lambda c, j: (0, 0)),          # z0
        ],
        out_specs=pl.BlockSpec((_SUB, _LANE), lambda c, j: (c, 0)),
        scratch_shapes=[pltpu.VMEM((_SUB, _LANE), jnp.float32)],
        compiler_params=pltpu.CompilerParams(
            dimension_semantics=("parallel", "arbitrary"),
            vmem_limit_bytes=32 * 1024 * 1024),
    )(xn, xp, x0_2, x0r_2, zn2, zp2, yn2, yp2, z0)

    # Per-core partials live at rows 0 and 8, lane 0.
    return out[0, 0] + out[_SUB, 0]


def _reference_loss(pred, lambda_trans_loss, lambda_yobs_loss):
    """Pure-JAX reference mirroring the PyTorch code exactly (validation only)."""
    (X_next_pred, X_next, Z_next_pred, Z_next,
     Yobs_pred, Yobs, z0, x0, x0_rec) = pred
    v = 0.1

    def rec(x, xd):
        x = x.reshape(x.shape[0], -1)
        xd = xd.reshape(xd.shape[0], -1)
        return jnp.mean(jnp.sum((x - xd) ** 2 / (2 * v), axis=-1))

    def l2(q):
        return jnp.mean(jnp.sum(0.5 * q ** 2, axis=-1))

    loss_rec_t = rec(x0, x0_rec)
    loss_rec_t1 = sum(rec(xn, xp) for xn, xp in zip(X_next, X_next_pred))
    loss_l2 = l2(z0)
    loss_trans = sum(l2(zn - zp) for zn, zp in zip(Z_next, Z_next_pred))
    loss_yobs = sum(l2(yn - yp) for yn, yp in zip(Yobs, Yobs_pred))
    return (loss_rec_t + loss_rec_t1 + loss_l2
            + lambda_trans_loss * loss_trans + lambda_yobs_loss * loss_yobs)


if __name__ == "__main__":
    key = jax.random.PRNGKey(0)
    T, B, C, H, W = 8, 2, 4, 16, 16
    Dz, Dy = 32, 8

    ks = jax.random.split(key, 9)
    X_next_pred = jax.random.normal(ks[0], (T, B, C, H, W), jnp.float32)
    X_next = jax.random.normal(ks[1], (T, B, C, H, W), jnp.float32)
    Z_next_pred = jax.random.normal(ks[2], (T, B, Dz), jnp.float32)
    Z_next = jax.random.normal(ks[3], (T, B, Dz), jnp.float32)
    Yobs_pred = jax.random.normal(ks[4], (T, B, Dy), jnp.float32)
    Yobs = jax.random.normal(ks[5], (T, B, Dy), jnp.float32)
    z0 = jax.random.normal(ks[6], (B, Dz), jnp.float32)
    x0 = jax.random.normal(ks[7], (B, C, H, W), jnp.float32)
    x0_rec = jax.random.normal(ks[8], (B, C, H, W), jnp.float32)

    pred = (X_next_pred, X_next, Z_next_pred, Z_next,
            Yobs_pred, Yobs, z0, x0, x0_rec)

    lam_flux, lam_bhp, lam_trans, lam_yobs = 1.0, 1.0, 0.3, 0.7

    total = customized_loss(pred, lam_flux, lam_bhp, lam_trans, lam_yobs)
    total = jax.block_until_ready(total)

    ref = jax.block_until_ready(_reference_loss(pred, lam_trans, lam_yobs))
    assert jnp.abs(total - ref) / (jnp.abs(ref) + 1e-6) < 1e-4, (total, ref)

    print("KERNEL_OK")
</pallas_src>

<mosaic_0001>
module attributes {stable_mosaic.version = 11 : i64} {
  func.func @_fused_loss_kernel(%arg0: i32, %arg1: i32, %arg2: memref<128x128xf32, #tpu.memory_space<vmem>>, %arg3: memref<128x128xf32, #tpu.memory_space<vmem>>, %arg4: memref<16x128xf32, #tpu.memory_space<vmem>>, %arg5: memref<16x128xf32, #tpu.memory_space<vmem>>, %arg6: memref<16x32xf32, #tpu.memory_space<vmem>>, %arg7: memref<16x32xf32, #tpu.memory_space<vmem>>, %arg8: memref<16x8xf32, #tpu.memory_space<vmem>>, %arg9: memref<16x8xf32, #tpu.memory_space<vmem>>, %arg10: memref<2x32xf32, #tpu.memory_space<vmem>>, %arg11: memref<8x128xf32, #tpu.memory_space<vmem>>, %arg12: memref<8x128xf32, #tpu.memory_space<vmem>>) attributes {dimension_semantics = [#tpu.dimension_semantics<parallel>, #tpu.dimension_semantics<arbitrary>], iteration_bounds = array<i64: 2, 1>, scalar_prefetch = 0 : i64, scratch_operands = 1 : i64, tpu.core_type = #tpu.core_type<tc>, window_params = [{transform_indices = @transform_0, window_bounds = array<i64: 128, 128>}, {transform_indices = @transform_1, window_bounds = array<i64: 128, 128>}, {pipeline_mode = #tpu.pipeline_mode<synchronous>, transform_indices = @transform_2, window_bounds = array<i64: 16, 128>}, {pipeline_mode = #tpu.pipeline_mode<synchronous>, transform_indices = @transform_3, window_bounds = array<i64: 16, 128>}, {pipeline_mode = #tpu.pipeline_mode<synchronous>, transform_indices = @transform_4, window_bounds = array<i64: 16, 32>}, {pipeline_mode = #tpu.pipeline_mode<synchronous>, transform_indices = @transform_5, window_bounds = array<i64: 16, 32>}, {pipeline_mode = #tpu.pipeline_mode<synchronous>, transform_indices = @transform_6, window_bounds = array<i64: 16, 8>}, {pipeline_mode = #tpu.pipeline_mode<synchronous>, transform_indices = @transform_7, window_bounds = array<i64: 16, 8>}, {pipeline_mode = #tpu.pipeline_mode<synchronous>, transform_indices = @transform_8, window_bounds = array<i64: 2, 32>}, {transform_indices = @transform_9, window_bounds = array<i64: 8, 128>}]} {
    %c1_i32 = arith.constant 1 : i32
    %0 = arith.muli %arg0, %c1_i32 : i32
    %1 = arith.addi %0, %arg1 : i32
    %c0_i32 = arith.constant 0 : i32
    %2 = arith.cmpi eq, %arg1, %c0_i32 : i32
    %3 = arith.extui %2 : i1 to i32
    %c0_i32_0 = arith.constant 0 : i32
    %4 = arith.cmpi ne, %3, %c0_i32_0 : i32
    scf.if %4 {
      %cst_12 = arith.constant 0.000000e+00 : f32
      %26 = vector.broadcast %cst_12 : f32 to vector<8x128xf32>
      %c0_13 = arith.constant 0 : index
      %c0_14 = arith.constant 0 : index
      %27 = vector.load %arg12[%c0_13, %c0_14] : memref<8x128xf32, #tpu.memory_space<vmem>>, vector<8x128xf32>
      tpu.vector_store %arg12[%c0_13, %c0_14], %26 {strides = array<i32>} : memref<8x128xf32, #tpu.memory_space<vmem>>, vector<8x128xf32>,
    } else {
    }
    %c0 = arith.constant 0 : index
    %c0_1 = arith.constant 0 : index
    %5 = vector.load %arg2[%c0, %c0_1] : memref<128x128xf32, #tpu.memory_space<vmem>>, vector<128x128xf32>
    %c0_2 = arith.constant 0 : index
    %c0_3 = arith.constant 0 : index
    %6 = vector.load %arg3[%c0_2, %c0_3] : memref<128x128xf32, #tpu.memory_space<vmem>>, vector<128x128xf32>
    %7 = arith.subf %5, %6 : vector<128x128xf32>
    %8 = arith.mulf %7, %7 : vector<128x128xf32>
    %c128_i32 = arith.constant 128 : i32
    %9 = arith.muli %1, %c128_i32 : i32
    %c128_i32_4 = arith.constant 128 : i32
    %10 = arith.subi %c128_i32_4, %9 : i32
    %11 = tpu.iota {dimensions = array<i32: 0>} : vector<128x1xi32>
    %12 = vector.broadcast %10 : i32 to vector<128x1xi32>
    %13 = arith.cmpi slt, %11, %12 : vector<128x1xi32>
    %cst = arith.constant 0.000000e+00 : f32
    %14 = vector.shape_cast %13 : vector<128x1xi1> to vector<128x1xi1>
    %15 = vector.broadcast %14 : vector<128x1xi1> to vector<128x128xi1>
    %16 = vector.broadcast %cst : f32 to vector<128x128xf32>
    %17 = arith.select %15, %8, %16 : vector<128x128xi1>, vector<128x128xf32>
    %c0_5 = arith.constant 0 : index
    %c0_6 = arith.constant 0 : index
    %18 = vector.load %arg12[%c0_5, %c0_6] : memref<8x128xf32, #tpu.memory_space<vmem>>, vector<8x128xf32>
    %19 = vector.shape_cast %17 : vector<128x128xf32> to vector<16x8x128xf32>
    %cst_7 = arith.constant dense<0.000000e+00> : vector<8x128xf32>
    %20 = vector.multi_reduction <add>, %19, %cst_7 [0] : vector<16x8x128xf32> to vector<8x128xf32>
    %21 = arith.addf %18, %20 : vector<8x128xf32>
    %c0_8 = arith.constant 0 : index
    %c0_9 = arith.constant 0 : index
    %22 = vector.load %arg12[%c0_8, %c0_9] : memref<8x128xf32, #tpu.memory_space<vmem>>, vector<8x128xf32>
    tpu.vector_store %arg12[%c0_8, %c0_9], %21 {strides = array<i32>} : memref<8x128xf32, #tpu.memory_space<vmem>>, vector<8x128xf32>,
    %c0_i32_10 = arith.constant 0 : i32
    %23 = arith.cmpi eq, %arg1, %c0_i32_10 : i32
    %24 = arith.extui %23 : i1 to i32
    %c0_i32_11 = arith.constant 0 : i32
    %25 = arith.cmpi ne, %24, %c0_i32_11 : i32
    scf.if %25 {
      %c0_12 = arith.constant 0 : index
      %c0_13 = arith.constant 0 : index
      %26 = vector.load %arg12[%c0_12, %c0_13] : memref<8x128xf32, #tpu.memory_space<vmem>>, vector<8x128xf32>
      %27 = vector.shape_cast %26 : vector<8x128xf32> to vector<1x8x128xf32>
      %cst_14 = arith.constant dense<0.000000e+00> : vector<1xf32>
      %28 = vector.multi_reduction <add>, %27, %cst_14 [1, 2] : vector<1x8x128xf32> to vector<1xf32>
      %29 = vector.shape_cast %28 : vector<1xf32> to vector<1x1x1xf32>
      %30 = vector.extract %29[0, 0, 0] : f32 from vector<1x1x1xf32>
      %cst_15 = arith.constant 2.500000e+00 : f32
      %31 = arith.mulf %cst_15, %30 : f32
      %c0_16 = arith.constant 0 : index
      %c0_17 = arith.constant 0 : index
      %32 = vector.load %arg4[%c0_16, %c0_17] : memref<16x128xf32, #tpu.memory_space<vmem>>, vector<16x128xf32>
      %c0_18 = arith.constant 0 : index
      %c0_19 = arith.constant 0 : index
      %33 = vector.load %arg5[%c0_18, %c0_19] : memref<16x128xf32, #tpu.memory_space<vmem>>, vector<16x128xf32>
      %34 = arith.subf %32, %33 : vector<16x128xf32>
      %c0_20 = arith.constant 0 : index
      %c0_21 = arith.constant 0 : index
      %35 = vector.load %arg6[%c0_20, %c0_21] : memref<16x32xf32, #tpu.memory_space<vmem>>, vector<16x32xf32>
      %c0_22 = arith.constant 0 : index
      %c0_23 = arith.constant 0 : index
      %36 = vector.load %arg7[%c0_22, %c0_23] : memref<16x32xf32, #tpu.memory_space<vmem>>, vector<16x32xf32>
      %37 = arith.subf %35, %36 : vector<16x32xf32>
      %c0_24 = arith.constant 0 : index
      %c0_25 = arith.constant 0 : index
      %38 = vector.load %arg8[%c0_24, %c0_25] : memref<16x8xf32, #tpu.memory_space<vmem>>, vector<16x8xf32>
      %c0_26 = arith.constant 0 : index
      %c0_27 = arith.constant 0 : index
      %39 = vector.load %arg9[%c0_26, %c0_27] : memref<16x8xf32, #tpu.memory_space<vmem>>, vector<16x8xf32>
      %40 = arith.subf %38, %39 : vector<16x8xf32>
      %c0_28 = arith.constant 0 : index
      %c0_29 = arith.constant 0 : index
      %41 = vector.load %arg10[%c0_28, %c0_29] : memref<2x32xf32, #tpu.memory_space<vmem>>, vector<2x32xf32>
      %42 = arith.mulf %34, %34 : vector<16x128xf32>
      %43 = vector.shape_cast %42 : vector<16x128xf32> to vector<1x16x128xf32>
      %cst_30 = arith.constant dense<0.000000e+00> : vector<1xf32>
      %44 = vector.multi_reduction <add>, %43, %cst_30 [1, 2] : vector<1x16x128xf32> to vector<1xf32>
      %45 = vector.shape_cast %44 : vector<1xf32> to vector<1x1x1xf32>
      %46 = vector.extract %45[0, 0, 0] : f32 from vector<1x1x1xf32>
      %cst_31 = arith.constant 2.500000e+00 : f32
      %47 = arith.mulf %cst_31, %46 : f32
      %48 = arith.mulf %41, %41 : vector<2x32xf32>
      %49 = vector.shape_cast %48 : vector<2x32xf32> to vector<1x2x32xf32>
      %cst_32 = arith.constant dense<0.000000e+00> : vector<1xf32>
      %50 = vector.multi_reduction <add>, %49, %cst_32 [1, 2] : vector<1x2x32xf32> to vector<1xf32>
      %51 = vector.shape_cast %50 : vector<1xf32> to vector<1x1x1xf32>
      %52 = vector.extract %51[0, 0, 0] : f32 from vector<1x1x1xf32>
      %cst_33 = arith.constant 2.500000e-01 : f32
      %53 = arith.mulf %cst_33, %52 : f32
      %54 = arith.addf %47, %53 : f32
      %55 = arith.mulf %37, %37 : vector<16x32xf32>
      %56 = vector.shape_cast %55 : vector<16x32xf32> to vector<1x16x32xf32>
      %cst_34 = arith.constant dense<0.000000e+00> : vector<1xf32>
      %57 = vector.multi_reduction <add>, %56, %cst_34 [1, 2] : vector<1x16x32xf32> to vector<1xf32>
      %58 = vector.shape_cast %57 : vector<1xf32> to vector<1x1x1xf32>
      %59 = vector.extract %58[0, 0, 0] : f32 from vector<1x1x1xf32>
      %cst_35 = arith.constant 7.500000e-02 : f32
      %60 = arith.mulf %cst_35, %59 : f32
      %61 = arith.addf %54, %60 : f32
      %62 = arith.mulf %40, %40 : vector<16x8xf32>
      %63 = vector.shape_cast %62 : vector<16x8xf32> to vector<1x16x8xf32>
      %cst_36 = arith.constant dense<0.000000e+00> : vector<1xf32>
      %64 = vector.multi_reduction <add>, %63, %cst_36 [1, 2] : vector<1x16x8xf32> to vector<1xf32>
      %65 = vector.shape_cast %64 : vector<1xf32> to vector<1x1x1xf32>
      %66 = vector.extract %65[0, 0, 0] : f32 from vector<1x1x1xf32>
      %cst_37 = arith.constant 1.750000e-01 : f32
      %67 = arith.mulf %cst_37, %66 : f32
      %68 = arith.addf %61, %67 : f32
      %c0_i32_38 = arith.constant 0 : i32
      %69 = arith.cmpi eq, %arg0, %c0_i32_38 : i32
      %cst_39 = arith.constant 0.000000e+00 : f32
      %70 = arith.select %69, %68, %cst_39 : f32
      %71 = arith.addf %31, %70 : f32
      %cst_40 = arith.constant 0.000000e+00 : f32
      %72 = vector.broadcast %cst_40 : f32 to vector<8x128xf32>
      %73 = vector.broadcast %71 : f32 to vector<8x128xf32>
      %74 = arith.addf %72, %73 : vector<8x128xf32>
      %c0_41 = arith.constant 0 : index
      %c0_42 = arith.constant 0 : index
      %75 = vector.load %arg11[%c0_41, %c0_42] : memref<8x128xf32, #tpu.memory_space<vmem>>, vector<8x128xf32>
      tpu.vector_store %arg11[%c0_41, %c0_42], %74 {strides = array<i32>} : memref<8x128xf32, #tpu.memory_space<vmem>>, vector<8x128xf32>,
    } else {
    }
    return
  }
  func.func @transform_0(%arg0: i32, %arg1: i32) -> (i32, i32) {
    %c1_i32 = arith.constant 1 : i32
    %0 = arith.muli %arg0, %c1_i32 : i32
    %1 = arith.addi %0, %arg1 : i32
    %c0_i32 = arith.constant 0 : i32
    %2 = arith.minsi %1, %c0_i32 : i32
    %c0_i32_0 = arith.constant 0 : i32
    %c0_i32_1 = arith.constant 0 : i32
    return %2, %c0_i32_0 : i32, i32
  }
  func.func @transform_1(%arg0: i32, %arg1: i32) -> (i32, i32) {
    %c1_i32 = arith.constant 1 : i32
    %0 = arith.muli %arg0, %c1_i32 : i32
    %1 = arith.addi %0, %arg1 : i32
    %c0_i32 = arith.constant 0 : i32
    %2 = arith.minsi %1, %c0_i32 : i32
    %c0_i32_0 = arith.constant 0 : i32
    %c0_i32_1 = arith.constant 0 : i32
    return %2, %c0_i32_0 : i32, i32
  }
  func.func @transform_2(%arg0: i32, %arg1: i32) -> (i32, i32) {
    %c0_i32 = arith.constant 0 : i32
    %c0_i32_0 = arith.constant 0 : i32
    %c0_i32_1 = arith.constant 0 : i32
    return %c0_i32, %c0_i32_0 : i32, i32
  }
  func.func @transform_3(%arg0: i32, %arg1: i32) -> (i32, i32) {
    %c0_i32 = arith.constant 0 : i32
    %c0_i32_0 = arith.constant 0 : i32
    %c0_i32_1 = arith.constant 0 : i32
    return %c0_i32, %c0_i32_0 : i32, i32
  }
  func.func @transform_4(%arg0: i32, %arg1: i32) -> (i32, i32) {
    %c0_i32 = arith.constant 0 : i32
    %c0_i32_0 = arith.constant 0 : i32
    %c0_i32_1 = arith.constant 0 : i32
    return %c0_i32, %c0_i32_0 : i32, i32
  }
  func.func @transform_5(%arg0: i32, %arg1: i32) -> (i32, i32) {
    %c0_i32 = arith.constant 0 : i32
    %c0_i32_0 = arith.constant 0 : i32
    %c0_i32_1 = arith.constant 0 : i32
    return %c0_i32, %c0_i32_0 : i32, i32
  }
  func.func @transform_6(%arg0: i32, %arg1: i32) -> (i32, i32) {
    %c0_i32 = arith.constant 0 : i32
    %c0_i32_0 = arith.constant 0 : i32
    %c0_i32_1 = arith.constant 0 : i32
    return %c0_i32, %c0_i32_0 : i32, i32
  }
  func.func @transform_7(%arg0: i32, %arg1: i32) -> (i32, i32) {
    %c0_i32 = arith.constant 0 : i32
    %c0_i32_0 = arith.constant 0 : i32
    %c0_i32_1 = arith.constant 0 : i32
    return %c0_i32, %c0_i32_0 : i32, i32
  }
  func.func @transform_8(%arg0: i32, %arg1: i32) -> (i32, i32) {
    %c0_i32 = arith.constant 0 : i32
    %c0_i32_0 = arith.constant 0 : i32
    %c0_i32_1 = arith.constant 0 : i32
    return %c0_i32, %c0_i32_0 : i32, i32
  }
  func.func @transform_9(%arg0: i32, %arg1: i32) -> (i32, i32) {
    %c0_i32 = arith.constant 0 : i32
    %c0_i32_0 = arith.constant 0 : i32
    return %arg0, %c0_i32 : i32, i32
  }
}

</mosaic_0001>

<bundles_post_ra>
// kernel: tpu_custom_call.1
= control target key start
LH: loop header
LB: loop body
LE: loop exit
PB: predicated region body
PF: predicated region fallthrough
CT: control target
= control target key end

     0   :  { %s1483_s0 = inlined_call_operand.hbm [shape: f32[128,128], index: 0, kind: input, shape index: {}]   ;;  %s1484_s1 = inlined_call_operand.hbm [shape: f32[128,128], index: 1, kind: input, shape index: {}]   ;;  %s1485_s2 = inlined_call_operand.vmem [shape: f32[16,128], index: 2, kind: input, shape index: {}]   ;;  %s1486_s3 = inlined_call_operand.vmem [shape: f32[16,128], index: 3, kind: input, shape index: {}]   ;;  %s1487_s4 = inlined_call_operand.vmem [shape: f32[16,32], index: 4, kind: input, shape index: {}]   ;;  %s1488_s5 = inlined_call_operand.vmem [shape: f32[16,32], index: 5, kind: input, shape index: {}]   ;;  %s1489_s6 = inlined_call_operand.vmem [shape: f32[16,8], index: 6, kind: input, shape index: {}]   ;;  %s1490_s7 = inlined_call_operand.vmem [shape: f32[16,8], index: 7, kind: input, shape index: {}]   ;;  %s1491_s8 = inlined_call_operand.vmem [shape: f32[2,32], index: 8, kind: input, shape index: {}]   ;;  %s1492_s9 = inlined_call_operand.hbm [shape: f32[16,128], index: 9, kind: output, shape index: {}]  }
   0x1   :  { %1500 = sst [smem:[#allocation17_spill]] %s1483_s0 }
   0x2   :  { %1501 = sst [smem:[#allocation18_spill]] %s1484_s1 }
   0x3   :  { %1502 = sst [smem:[#allocation19_spill]] %s1485_s2 }
   0x4   :  { %1503 = sst [smem:[#allocation20_spill]] %s1486_s3 }
   0x5   :  { %1504 = sst [smem:[#allocation21_spill]] %s1487_s4 }
   0x6   :  { %1505 = sst [smem:[#allocation22_spill]] %s1488_s5 }
   0x7   :  { %14 = vsyncpa [#allocation4], 0 }
   0x8   :  { %16 = vsyncpa [#allocation4 + $0x1], 0 }
   0x9   :  { %17 = vsyncpa [#allocation7], 0 }
   0xa   :  { %19 = vsyncpa [#allocation7 + $0x1], 0 }
   0xb   :  { %20 = vsyncpa [#allocation5], 0 }
   0xc   :  { %22 = vsyncpa [#allocation5 + $0x1], 0  ;;  %s1164_s30 = smov 0   ;;  %s1166_s10 = smov 0  }
   0xd   :  { %s1168_s11 = smov 0   ;;  %s1170_s12 = smov 0  }
   0xe   :  { %s1172_s13 = smov 0   ;;  %s1174_s14 = smov 0  }
   0xf   :  { %s1176_s15 = smov 0   ;;  %s1178_s16 = smov 0  }
  0x10 LB: > { %1506 = sst [smem:[#allocation12_spill]] %s1087_s11  ;;  %s816_s17 = sadd.s32 4294967295, %s1107_s16   ;;  %s1107_s16 = sphi %s1178_s16, %s28_s16   ;;  %s1103_s15 = sphi %s1176_s15, %s1533_s15   ;;  %s1099_s14 = sphi %s1174_s14, %s1532_s14   ;;  %s1095_s13 = sphi %s1172_s13, %s1473_s13   ;;  %s1091_s12 = sphi %s1170_s12, %s1536_s12   ;;  %s1087_s11 = sphi %s1168_s11, %s1531_s11   ;;  %s1083_s10 = sphi %s1166_s10, %s1535_s10   ;;  %s1079_s30 = sphi %s1164_s30, %s1534_s30  }
  0x11   : > { %1507 = sst [smem:[#allocation13_spill]] %s1103_s15  ;;  %s817_s18 = sadd.s32 4294967294, %s1107_s16  }
  0x12   : > { %s40_s19 = sadd.s32 1, %s1103_s15  ;;  %p1076_p1 = scmp.ne.s32.totalorder %s1095_s13, 0 }
  0x13   : > { %p42_p0 = scmp.ge.s32.totalorder %s40_s19, 2  ;;  %p61_p2 = scmp.eq.s32.totalorder %s1107_s16, 0 }
  0x14   : > { %p66_p3 = scmp.ne.s32.totalorder %s1095_s13, %s1091_s12  ;;  %p67_p5 = scmp.eq.s32.totalorder %s816_s17, 0 }
  0x15   : > { %s1538_s19 = smov (%p42_p0, %s40_s19), 0  ;;  %p1210_p4 = por %p1076_p1, %p61_p2 }
  0x16   : > { %1508 = sst [smem:[#allocation14_spill]] %s1538_s19  ;;  %p1214_p6 = por %p67_p5, %p66_p3 }
  0x17   : > { %s255_s22 = ssub.s32 %s1103_s15, %s1538_s19  ;;  %s258_s23 = sadd.s32 1, %s1087_s11 }
  0x18   : > { %s1510_s21 = scalar_select %p1214_p6, 1, 0 }
  0x19   : > { %p256_p7 = scmp.eq.s32.totalorder %s255_s22, 0  ;;  %p268_p8 = scmp.ne.s32.totalorder %s1087_s11, %s1083_s10 }
  0x1a   : > { %p269_p9 = scmp.eq.s32.totalorder %s816_s17, 1  ;;  %p274_p10 = scmp.ne.s32.totalorder %s1083_s10, %s1079_s30 }
  0x1b   : > { %s1222_s24 = scalar_select %p256_p7, %s1087_s11, %s258_s23  }
  0x1c   : > { %p275_p11 = scmp.eq.s32.totalorder %s817_s18, 1  ;;  %p1228_p12 = por %p269_p9, %p268_p8 }
  0x1d   : > { %1511 = sst [smem:[#allocation15_spill]] %s1222_s24  ;;  %p864_p1 = scmp.lt.s32.totalorder %s1107_s16, 2 }
  0x1e   : > { %s1512_s25 = scalar_select %p1228_p12, 1, 0 }
  0x1f   : > { %p1233_p0 = por %p275_p11, %p274_p10  ;;  %s1109_s27 = smov [#allocation3]  }
  0x20   : > { %s330_s28 = sshll.u32 %s1109_s27, 4  ;;  %p1240_p2 = pnand %p864_p1, %p1210_p4  ;;  %s331_s28 = int_to_ptr.vmem [resolvable:$true] %s330_s28 }
  0x21   : > { %s1513_s26 = scalar_select %p1233_p0, 1, 0 }
  0x22   : > { %s1516_s0 = sld [smem:[#allocation17_spill]]  ;;  %p942_p5 = pneg %p1240_p2 }
  0x23   : > { %1514 = sst [smem:[#allocation16_spill]] %s1513_s26 }
  0x28   : > { %s940_s18 = scalar_lea.hbm %s1516_s0, 2048 }
  0x29   : > { %p941_p3 = scmp.ne.s32.totalorder %s1516_s0, %s940_s18  ;;  %p947_p8 = scmp.lt.u32.totalorder %s940_s18, %s940_s18 }
  0x2a   : > { %p949_p9 = scmp.lt.u32.totalorder %s940_s18, %s1516_s0 }
  0x2b   : > { %p943_p7 = pnand %p942_p5, %p941_p3 }
  0x2c   : > { %p950_p10 = por %p949_p9, %p947_p8 }
  0x2d   : > { %p944_p4 = pneg %p943_p7 }
  0x2f   : > { %p951_p11 = pnand %p950_p10, %p944_p4 }
  0x31   : > { %954 = shalt.err (!%p951_p11)
}
  0x32   : > { %s955_s12 = scalar_lea.vmem %s331_s28, 2048  ;;  %s962_s17 = scalar_lea.vmem %s331_s28, 4096 }
  0x33   : > { %p956_p1 = scmp.ne.s32.totalorder %s331_s28, %s955_s12  ;;  %p963_p12 = scmp.lt.s32.totalorder %s331_s28, %s331_s28 }
  0x34   : > { %p964_p6 = scmp.lt.s32.totalorder %s962_s17, %s955_s12 }
  0x35   : > { %p958_p13 = pnand %p956_p1, %p942_p5 }
  0x36   : > { %p965_p3 = por %p964_p6, %p963_p12 }
  0x37   : > { %p959_p0 = pneg %p958_p13 }
  0x39   : > { %p966_p7 = pnand %p965_p3, %p959_p0 }
  0x3b   : > { %969 = shalt.err (!%p966_p7)
}
  0x3c   : > { %s1110_s22 = smov 128   ;;  %s1111_s18 = smov 8  }
  0x3d   : > { %856 = dma.hbm_to_vmem [thread:$0]  (!%p1240_p2), %s1516_s0, 2048, %s331_s28, [#allocation4], %s1110_s22, %s1110_s22, %s1111_s18  }
  0x3e   : > { %p826_p13 = scmp.ge.s32.totalorder %s1107_s16, 1  ;;  %p362_p4 = scmp.lt.s32.totalorder %s1107_s16, 3 }
  0x3f   : > { %s1112_s12 = smov [#allocation6]   ;;  %s1518_s1 = sld [smem:[#allocation18_spill]] }
  0x40   : > { %p1271_p8 = pnand %p826_p13, %p362_p4  ;;  %s354_s17 = sshll.u32 %s1112_s12, 4  ;;  %s355_s17 = int_to_ptr.vmem [resolvable:$true] %s354_s17 }
  0x42   : > { %s1517_s27 = scalar_select %p1271_p8, 1, 0 }
  0x45   : > { %s970_s24 = scalar_lea.hbm %s1518_s1, 2048 }
  0x46   : > { %p971_p6 = scmp.ne.s32.totalorder %s1518_s1, %s970_s24  ;;  %p977_p9 = scmp.lt.u32.totalorder %s970_s24, %s970_s24 }
  0x47   : > { %p979_p10 = scmp.lt.u32.totalorder %s970_s24, %s1518_s1 }
  0x48   : > { %p973_p12 = pnand %p971_p6, %p942_p5 }
  0x49   : > { %p980_p11 = por %p979_p10, %p977_p9 }
  0x4a   : > { %p974_p0 = pneg %p973_p12 }
  0x4c   : > { %p981_p1 = pnand %p980_p11, %p974_p0 }
  0x4e   : > { %984 = shalt.err (!%p981_p1)
}
  0x4f   : > { %s985_s20 = scalar_lea.vmem %s355_s17, 2048  ;;  %s992_s11 = scalar_lea.vmem %s355_s17, 4096 }
  0x50   : > { %p986_p3 = scmp.ne.s32.totalorder %s355_s17, %s985_s20  ;;  %p993_p4 = scmp.lt.s32.totalorder %s355_s17, %s355_s17 }
  0x51   : > { %p994_p8 = scmp.lt.s32.totalorder %s992_s11, %s985_s20 }
  0x52   : > { %p988_p7 = pnand %p986_p3, %p942_p5 }
  0x53   : > { %p995_p6 = por %p994_p8, %p993_p4 }
  0x54   : > { %p989_p13 = pneg %p988_p7 }
  0x56   : > { %p996_p12 = pnand %p995_p6, %p989_p13 }
  0x58   : > { %999 = shalt.err (!%p996_p12)
}
  0x59   : > { %859 = dma.hbm_to_vmem [thread:$0]  (!%p1240_p2), %s1518_s1, 2048, %s355_s17, [#allocation7], %s1110_s22, %s1110_s22, %s1111_s18  }
  0x5a   : > { %p1519_p0 = scmp.ne.s32.totalorder %s1517_s27, 0 }
  0x5b   : > { %s368_s24 = sand.u32 (!%p1519_p0), 1, %s1095_s13   ;;  %p1520_p5 = scmp.ne.s32.totalorder (!%p1519_p0), %s1510_s21, 0 }
  0x5c   : > { %366 = sbr.rel (%p1519_p0) target bundleno = 381 (0x17d), region = 56  ;;  %s827_s26 = sshll.u32 (!%p1519_p0), %s368_s24, 7 }
  0x5d   : > { %s369_s12 = scalar_lea.sflag (!%p1519_p0), [#allocation4], %s368_s24  ;;  %s1301_s28 = scalar_lea.vmem (!%p1519_p0), [#allocation3], %s827_s26 }
  0x63   : > { %1065 = dma.done.wait (%p1520_p5), %s369_s12, 2048  }
  0x64   : > { %1067 = vsyncadd (%p1520_p5), %s369_s12, 4294965248  ;;  %s378_s29 = scalar_lea.sflag [#allocation7], %s368_s24  ;;  %s1307_s23 = scalar_lea.vmem [#allocation6], %s827_s26 }
  0x65   : > { %1069 = dma.done.wait (%p1520_p5), %s378_s29, 2048  }
  0x66   : > { %1071 = vsyncadd (%p1520_p5), %s378_s29, 4294965248  ;;  %s1521_s2 = sld [smem:[#allocation19_spill]]  ;;  %s1522_s3 = sld [smem:[#allocation20_spill]]  ;;  %v633_v5 = vld [vmem:[%s1491_s8] sm:$0x3]  ;;  %vm648_vm0 = vcmask 254976   ;;  %v501_v15 = vlaneseq }
  0x67   : > { %s1523_s4 = sld [smem:[#allocation21_spill]]  ;;  %v647_v8 = vmul.f32 %v633_v5, %v633_v5  ;;  %s1524_s5 = sld [smem:[#allocation22_spill]]  ;;  %vm663_vm1 = vcmask 261120   ;;  %v435_v23 = vld [vmem:[%s1301_s28] sm:$0xff]  ;;  %v436_v24 = vld [vmem:[%s1301_s28 + $0x8] sm:$0xff]  ;;  %v437_v29 = vld [vmem:[%s1301_s28 + $0x10] sm:$0xff] }
  0x68   : > { %s1499_s11 = sshll.u32 %s1099_s14, 7  ;;  %v1343_v25 = vshrl.u32 %v501_v15, 7  ;;  %v451_v27 = vld [vmem:[%s1307_s23] sm:$0xff]  ;;  %v452_v28 = vld [vmem:[%s1307_s23 + $0x8] sm:$0xff]  ;;  %v453_v30 = vld [vmem:[%s1307_s23 + $0x10] sm:$0xff]  ;;  %s418_s22 = sand.u32 1, %s1083_s10  }
  0x69   : > { %v649_v17 = vsel %vm648_vm0, %v647_v8, 0.0  ;;  %s500_s15 = ssub.s32 128, %s1499_s11  ;;  %v467_v31 = vsub.f32 %v435_v23, %v451_v27  ;;  %v468_v32 = vsub.f32 %v436_v24, %v452_v28  ;;  %v438_v33 = vld [vmem:[%s1301_s28 + $0x18] sm:$0xff]  ;;  %v469_v36 = vsub.f32 %v437_v29, %v453_v30  ;;  %v439_v38 = vld [vmem:[%s1301_s28 + $0x20] sm:$0xff]  ;;  %v440_v44 = vld [vmem:[%s1301_s28 + $0x28] sm:$0xff]  ;;  %s829_s17 = sshll.u32 %s418_s22, 3 }
  0x6a   : > { %650 = vadd.xlane.f32.xlu1 %v649_v17  ;;  %v454_v34 = vld [vmem:[%s1307_s23 + $0x18] sm:$0xff]  ;;  %v503_v35 = vadd.s32 8, %v1343_v25  ;;  %v1354_v37 = vstv %s500_s15  ;;  %v455_v39 = vld [vmem:[%s1307_s23 + $0x20] sm:$0xff]  ;;  %v504_v40 = vadd.s32 16, %v1343_v25  ;;  %v456_v45 = vld [vmem:[%s1307_s23 + $0x28] sm:$0xff]  ;;  %v505_v46 = vadd.s32 24, %v1343_v25 }
  0x6b   : > { %v470_v41 = vsub.f32 %v438_v33, %v454_v34  ;;  %v483_v42 = vmul.f32 %v467_v31, %v467_v31  ;;  %v484_v43 = vmul.f32 %v468_v32, %v468_v32  ;;  %vm519_vm2 = vcmp.lt.s32.totalorder %v1343_v25, %v1354_v37  ;;  %v441_v49 = vld [vmem:[%s1301_s28 + $0x30] sm:$0xff]  ;;  %v442_v56 = vld [vmem:[%s1301_s28 + $0x38] sm:$0xff]  ;;  %v443_v62 = vld [vmem:[%s1301_s28 + $0x40] sm:$0xff]  ;;  %p695_p2 = scmp.eq.s32.totalorder %s1099_s14, 0  ;;  %s420_s0 = scalar_lea.vmem [#allocation8], %s829_s17 }
  0x6c   : > { %v615_v0 = vld [vmem:[%s1521_s2] sm:$0xff]  ;;  %v616_v1 = vld [vmem:[%s1521_s2 + $0x8] sm:$0xff]  ;;  %vm520_vm3 = vcmp.lt.s32.totalorder %v503_v35, %v1354_v37  ;;  %v471_v47 = vsub.f32 %v439_v38, %v455_v39  ;;  %v485_v48 = vmul.f32 %v469_v36, %v469_v36  ;;  %v457_v50 = vld [vmem:[%s1307_s23 + $0x30] sm:$0xff]  ;;  %v506_v51 = vadd.s32 32, %v1343_v25  ;;  %s715_s1 = sshll.u32 %s420_s0, 4  ;;  %p1526_p9 = scmp.ne.s32.totalorder %s1512_s25, 0  ;;  %s1432_s1 = int_to_ptr.vmem [resolvable:$true] %s715_s1 }
  0x6d   : > { %v617_v2 = vld [vmem:[%s1522_s3] sm:$0xff]  ;;  %v618_v3 = vld [vmem:[%s1522_s3 + $0x8] sm:$0xff]  ;;  %vm521_vm4 = vcmp.lt.s32.totalorder %v504_v40, %v1354_v37  ;;  %v472_v52 = vsub.f32 %v440_v44, %v456_v45  ;;  %v486_v53 = vmul.f32 %v470_v41, %v470_v41  ;;  %v567_v54 = vsel %vm519_vm2, %v483_v42, 0.0  ;;  %v458_v57 = vld [vmem:[%s1307_s23 + $0x38] sm:$0xff]  ;;  %s1525_s3 = sshll.u32 %s1099_s14, 7 }
  0x6e   : > { %v619_v4 = vsub.f32 %v615_v0, %v617_v2  ;;  %v621_v6 = vld [vmem:[%s1523_s4] sm:$0xff]  ;;  %v620_v7 = vsub.f32 %v616_v1, %v618_v3  ;;  %v622_v9 = vld [vmem:[%s1523_s4 + $0x8] sm:$0xff]  ;;  %v568_v55 = vsel %vm520_vm3, %v484_v43, 0.0  ;;  %v507_v58 = vadd.s32 40, %v1343_v25  ;;  %v449_v42 = vld [vmem:[%s1301_s28 + $0x70] sm:$0xff] }
  0x6f   : > { %v623_v10 = vld [vmem:[%s1524_s5] sm:$0xff]  ;;  %v624_v11 = vld [vmem:[%s1524_s5 + $0x8] sm:$0xff]  ;;  %vm522_vm5 = vcmp.lt.s32.totalorder %v505_v46, %v1354_v37  ;;  %v473_v59 = vsub.f32 %v441_v49, %v457_v50  ;;  %v487_v60 = vmul.f32 %v471_v47, %v471_v47  ;;  %v569_v61 = vsel %vm521_vm4, %v485_v48, 0.0  ;;  %v465_v43 = vld [vmem:[%s1307_s23 + $0x70] sm:$0xff]  ;;  %s1430_s5 = scalar_lea.hbm %s1492_s9, %s1525_s3 }
  0x70   : > { %v634_v12 = vmul.f32 %v619_v4, %v619_v4  ;;  %v625_v13 = vsub.f32 %v621_v6, %v623_v10  ;;  %v626_v14 = vsub.f32 %v622_v9, %v624_v11  ;;  %v635_v16 = vmul.f32 %v620_v7, %v620_v7  ;;  %v459_v63 = vld [vmem:[%s1307_s23 + $0x40] sm:$0xff]  ;;  %v444_v5 = vld [vmem:[%s1301_s28 + $0x48] sm:$0xff]  ;;  %v450_v49 = vld [vmem:[%s1301_s28 + $0x78] sm:$0xff] }
  0x71   : > { %v508_v0 = vadd.s32 48, %v1343_v25  ;;  %vm523_vm6 = vcmp.lt.s32.totalorder %v506_v51, %v1354_v37  ;;  %v584_v1 = vadd.f32 %v568_v55, %v567_v54  ;;  %v474_v2 = vsub.f32 %v442_v56, %v458_v57  ;;  %v460_v6 = vld [vmem:[%s1307_s23 + $0x48] sm:$0xff]  ;;  %v447_v27 = vld [vmem:[%s1301_s28 + $0x60] sm:$0xff]  ;;  %v466_v50 = vld [vmem:[%s1307_s23 + $0x78] sm:$0xff] }
  0x72   : > { %v661_v18 = vmul.f32 %v625_v13, %v625_v13  ;;  %v662_v19 = vmul.f32 %v626_v14, %v626_v14  ;;  %v636_v20 = vadd.f32 %v635_v16, %v634_v12  ;;  %v488_v3 = vmul.f32 %v472_v52, %v472_v52  ;;  %v445_v12 = vld [vmem:[%s1301_s28 + $0x50] sm:$0xff]  ;;  %v463_v28 = vld [vmem:[%s1307_s23 + $0x60] sm:$0xff]  ;;  %v448_v34 = vld [vmem:[%s1301_s28 + $0x68] sm:$0xff] }
  0x73   : > { %v570_v4 = vsel %vm522_vm5, %v486_v53, 0.0  ;;  %v509_v7 = vadd.s32 56, %v1343_v25  ;;  %vm524_vm7 = vcmp.lt.s32.totalorder %v507_v58, %v1354_v37  ;;  %v585_v8 = vadd.f32 %v584_v1, %v569_v61  ;;  %v461_v13 = vld [vmem:[%s1307_s23 + $0x50] sm:$0xff]  ;;  %v464_v35 = vld [vmem:[%s1307_s23 + $0x68] sm:$0xff]  ;;  %v627_v56 = vld [vmem:[%s1489_s6] sm:$0xff] }
  0x74   : > { %v664_v21 = vsel %vm663_vm1, %v661_v18, 0.0  ;;  %v665_v22 = vsel %vm663_vm1, %v662_v19, 0.0  ;;  %637 = vadd.xlane.f32.xlu0 %v636_v20  ;;  %v475_v9 = vsub.f32 %v443_v62, %v459_v63  ;;  %v489_v10 = vmul.f32 %v473_v59, %v473_v59  ;;  %v446_v19 = vld [vmem:[%s1301_s28 + $0x58] sm:$0xff]  ;;  %v628_v59 = vld [vmem:[%s1489_s6 + $0x8] sm:$0xff] }
  0x75   : > { %v666_v26 = vadd.f32 %v665_v22, %v664_v21  ;;  %v571_v11 = vsel %vm523_vm6, %v487_v60, 0.0  ;;  %v510_v14 = vadd.s32 64, %v1343_v25  ;;  %vm525_vm8 = vcmp.lt.s32.totalorder %v508_v0, %v1354_v37  ;;  %v462_v20 = vld [vmem:[%s1307_s23 + $0x58] sm:$0xff]  ;;  %v629_v60 = vld [vmem:[%s1490_s7] sm:$0xff]  ;;  %v630_v61 = vld [vmem:[%s1490_s7 + $0x8] sm:$0xff] }
  0x76   : > { %v586_v15 = vadd.f32 %v585_v8, %v570_v4  ;;  %v476_v16 = vsub.f32 %v444_v5, %v460_v6  ;;  %v490_v17 = vmul.f32 %v474_v2, %v474_v2  ;;  %v572_v18 = vsel %vm524_vm7, %v488_v3, 0.0 }
  0x77   : > { %667 = vadd.xlane.f32.xlu1 %v666_v26  ;;  %v511_v21 = vadd.s32 72, %v1343_v25  ;;  %vm526_vm9 = vcmp.lt.s32.totalorder %v509_v7, %v1354_v37  ;;  %v477_v23 = vsub.f32 %v445_v12, %v461_v13  ;;  %v491_v24 = vmul.f32 %v475_v9, %v475_v9 }
  0x78   : > { %v587_v22 = vadd.f32 %v586_v15, %v571_v11  ;;  %v573_v26 = vsel %vm525_vm8, %v489_v10, 0.0  ;;  %v512_v29 = vadd.s32 80, %v1343_v25  ;;  %vm527_vm10 = vcmp.lt.s32.totalorder %v510_v14, %v1354_v37 }
  0x79   : > { %v478_v31 = vsub.f32 %v446_v19, %v462_v20  ;;  %v492_v32 = vmul.f32 %v476_v16, %v476_v16  ;;  %v574_v33 = vsel %vm526_vm9, %v490_v17, 0.0  ;;  %v513_v36 = vadd.s32 88, %v1343_v25 }
  0x7a   : > { %v588_v30 = vadd.f32 %v587_v22, %v572_v18  ;;  %vm528_vm11 = vcmp.lt.s32.totalorder %v511_v21, %v1354_v37  ;;  %v479_v39 = vsub.f32 %v447_v27, %v463_v28  ;;  %v493_v40 = vmul.f32 %v477_v23, %v477_v23 }
  0x7b   : > { %v575_v41 = vsel %vm527_vm10, %v491_v24, 0.0  ;;  %v514_v44 = vadd.s32 96, %v1343_v25  ;;  %vm529_vm12 = vcmp.lt.s32.totalorder %v512_v29, %v1354_v37  ;;  %v480_v46 = vsub.f32 %v448_v34, %v464_v35 }
  0x7c   : > { %v589_v38 = vadd.f32 %v588_v30, %v573_v26  ;;  %v494_v47 = vmul.f32 %v478_v31, %v478_v31  ;;  %v576_v48 = vsel %vm528_vm11, %v492_v32, 0.0  ;;  %v515_v51 = vadd.s32 104, %v1343_v25 }
  0x7d   : > { %vm530_vm13 = vcmp.lt.s32.totalorder %v513_v36, %v1354_v37  ;;  %v481_v53 = vsub.f32 %v449_v42, %v465_v43  ;;  %v495_v54 = vmul.f32 %v479_v39, %v479_v39  ;;  %v577_v55 = vsel %vm529_vm12, %v493_v40, 0.0 }
  0x7e   : > { %v590_v45 = vadd.f32 %v589_v38, %v574_v33  ;;  %v516_v57 = vadd.s32 112, %v1343_v25  ;;  %vm531_vm14 = vcmp.lt.s32.totalorder %v514_v44, %v1354_v37  ;;  %v482_v62 = vsub.f32 %v450_v49, %v466_v50 }
  0x7f   : > { %v496_v63 = vmul.f32 %v480_v46, %v480_v46  ;;  %v578_v0 = vsel %vm530_vm13, %v494_v47, 0.0  ;;  %v517_v1 = vadd.s32 120, %v1343_v25  ;;  %vm532_vm15 = vcmp.lt.s32.totalorder %v515_v51, %v1354_v37 }
  0x80   : > { %v591_v52 = vadd.f32 %v590_v45, %v575_v41  ;;  %v497_v3 = vmul.f32 %v481_v53, %v481_v53  ;;  %v579_v4 = vsel %vm531_vm14, %v495_v54, 0.0  ;;  %v631_v5 = vsub.f32 %v627_v56, %v629_v60 }
  0x81   : > { %v632_v6 = vsub.f32 %v628_v59, %v630_v61  ;;  %vm533_vm0 = vcmp.lt.s32.totalorder %v516_v57, %v1354_v37  ;;  %v498_v8 = vmul.f32 %v482_v62, %v482_v62  ;;  %v580_v9 = vsel %vm532_vm15, %v496_v63, 0.0 }
  0x82   : > { %v592_v58 = vadd.f32 %v591_v52, %v576_v48  ;;  %vm534_vm1 = vcmp.lt.s32.totalorder %v517_v1, %v1354_v37  ;;  %v581_v11 = vsel %vm533_vm0, %v497_v3, 0.0  ;;  %v678_v12 = vmul.f32 %v631_v5, %v631_v5 }
  0x83   : > { %v679_v13 = vmul.f32 %v632_v6, %v632_v6  ;;  %vm680_vm2 = vcmask 64512   ;;  %v582_v25 = vsel %vm534_vm1, %v498_v8, 0.0 }
  0x84   : > { %v593_v2 = vadd.f32 %v592_v58, %v577_v55  ;;  %v681_v16 = vsel %vm680_vm2, %v678_v12, 0.0 }
  0x85   : > { %v682_v17 = vsel %vm680_vm2, %v679_v13, 0.0 }
  0x86   : > { %v594_v7 = vadd.f32 %v593_v2, %v578_v0  ;;  %v683_v19 = vadd.f32 %v682_v17, %v681_v16 }
  0x88   : > { %v595_v10 = vadd.f32 %v594_v7, %v579_v4 }
  0x8a   : > { %v596_v14 = vadd.f32 %v595_v10, %v580_v9 }
  0x8c   : > { %v597_v15 = vadd.f32 %v596_v14, %v581_v11 }
  0x8e   : > { %v598_v18 = vadd.f32 %v597_v15, %v582_v25 }
  0x90   : > { %605 = vadd.xlane.f32.xlu0 %v598_v18 }
  0x94   : > { %684 = vadd.xlane.f32.xlu0 %v683_v19 }
  0xf7   : > { %v651_v20 = vpop.xlane.xlu1 %650 }
  0xf8   : > { %v652_v24 = vrot.slane %v651_v20, 4 }
  0xfa   : > { %v653_v27 = vadd.f32 %v652_v24, %v651_v20 }
  0xfc   : > { %v654_v31 = vrot.slane %v653_v27, 2 }
  0xfe   : > { %v655_v40 = vadd.f32 %v654_v31, %v653_v27 }
 0x100   : > { %v656_v47 = vrot.slane %v655_v40, 1 }
 0x101   : > { %v638_v21 = vpop.xlane.xlu0 %637 }
 0x102   : > { %v639_v23 = vrot.slane %v638_v21, 4  ;;  %v657_v52 = vadd.f32 %v656_v47, %v655_v40 }
 0x104   : > { %v668_v22 = vpop.xlane.xlu1 %667  ;;  %v640_v26 = vadd.f32 %v639_v23, %v638_v21 }
 0x105   : > { %v669_v37 = vrot.slane %v668_v22, 4 }
 0x106   : > { %v641_v29 = vrot.slane %v640_v26, 2 }
 0x107   : > { %v670_v28 = vadd.f32 %v669_v37, %v668_v22 }
 0x108   : > { %v642_v36 = vadd.f32 %v641_v29, %v640_v26 }
 0x109   : > { %v671_v33 = vrot.slane %v670_v28, 2 }
 0x10a   : > { %v643_v44 = vrot.slane %v642_v36, 1 }
 0x10b   : > { %v672_v41 = vadd.f32 %v671_v33, %v670_v28 }
 0x10c   : > { %v644_v51 = vadd.f32 %v643_v44, %v642_v36 }
 0x10d   : > { %v673_v48 = vrot.slane %v672_v41, 1 }
 0x10f   : > { %v674_v54 = vadd.f32 %v673_v48, %v672_v41 }
 0x11d   : > { %v606_v30 = vpop.xlane.xlu0 %605 }
 0x11e   : > { %v607_v32 = vrot.slane %v606_v30, 4 }
 0x120   : > { %v608_v34 = vadd.f32 %v607_v32, %v606_v30 }
 0x121   : > { %v685_v35 = vpop.xlane.xlu0 %684 }
 0x122   : > { %v609_v38 = vrot.slane %v608_v34, 2  ;;  %v686_v39 = vrot.slane %v685_v35, 4 }
 0x124   : > { %v687_v42 = vadd.f32 %v686_v39, %v685_v35  ;;  %v610_v43 = vadd.f32 %v609_v38, %v608_v34 }
 0x126   : > { %v688_v45 = vrot.slane %v687_v42, 2  ;;  %v611_v46 = vrot.slane %v610_v43, 1 }
 0x128   : > { %v689_v49 = vadd.f32 %v688_v45, %v687_v42  ;;  %v612_v50 = vadd.f32 %v611_v46, %v610_v43 }
 0x12a   : > { %837 = vpush %v612_v50  ;;  %v690_v53 = vrot.slane %v689_v49, 1 }
 0x12b   : > { %839 = vpush %v644_v51 }
 0x12c   : > { %841 = vpush %v657_v52  ;;  %v691_v55 = vadd.f32 %v690_v53, %v689_v49 }
 0x12d   : > { %843 = vpush %v674_v54 }
 0x12e   : > { %845 = vpush %v691_v55 }
 0x15b   : > { %s838_s18 = spop %837 }
 0x15c   : > { %s840_s27 = spop %839  ;;  %s614_s11 = smul.f32 2.5, %s838_s18 }
 0x15d   : > { %s646_s20 = smul.f32 2.5, %s840_s27  ;;  %s842_s15 = spop %841 }
 0x15e   : > { %s659_s19 = smul.f32 0.25, %s842_s15  ;;  %s844_s24 = spop %843 }
 0x15f   : > { %s676_s21 = smul.f32 0.075, %s844_s24  ;;  %s846_s28 = spop %845 }
 0x160   : > { %s660_s23 = sadd.f32 %s659_s19, %s646_s20  ;;  %s693_s26 = smul.f32 0.175, %s846_s28 }
 0x161   : > { %s702_s20 = scalar_lea.sflag [#allocation5], %s418_s22  ;;  %s1000_s15 = scalar_lea.vmem %s1432_s1, 128 }
 0x162   : > { %s677_s12 = sadd.f32 %s676_s21, %s660_s23  ;;  %p1001_p8 = scmp.ne.s32.totalorder %s1432_s1, %s1000_s15 }
 0x164   : > { %s694_s29 = sadd.f32 %s693_s26, %s677_s12  ;;  %p1002_p10 = pnand %p1001_p8, %p1526_p9 }
 0x166   : > { %s1540_s29 = smov (!%p695_p2, %s694_s29), 0.0  ;;  %p1003_p11 = pneg %p1002_p10 }
 0x167   : > { %s697_s2 = sadd.f32 %s1540_s29, %s614_s11  ;;  %s1113_s11 = smov [#allocation8]  }
 0x168   : > { %s1004_s14 = sshll.u32 %s1113_s11, 4  ;;  %s1005_s14 = int_to_ptr.vmem [resolvable:$false] %s1004_s14 }
 0x169   : > { %v698_v56 = vstv %s697_s2  ;;  %s1006_s18 = scalar_lea.vmem %s1005_s14, 256  ;;  %p1007_p1 = scmp.lt.s32.totalorder %s1432_s1, %s1005_s14 }
 0x16a   : > { %700 = vst [vmem:[%s420_s0] sm:$0xff] %v698_v56  ;;  %p1008_p3 = scmp.lt.s32.totalorder %s1006_s18, %s1000_s15 }
 0x16c   : > { %p1009_p7 = por %p1008_p3, %p1007_p1 }
 0x16e   : > { %p1010_p13 = pnand %p1009_p7, %p1003_p11 }
 0x170   : > { %1013 = shalt.err (!%p1010_p13)
}
 0x171   : > { %s1014_s0 = scalar_lea.hbm %s1430_s5, 128  ;;  %s1018_s4 = scalar_lea.hbm %s1492_s9, 256 }
 0x172   : > { %p1015_p4 = scmp.ne.s32.totalorder %s1430_s5, %s1014_s0  ;;  %p1019_p0 = scmp.lt.u32.totalorder %s1430_s5, %s1492_s9 }
 0x173   : > { %p1020_p5 = scmp.lt.u32.totalorder %s1018_s4, %s1014_s0  ;;  %p1022_p8 = scmp.lt.u32.totalorder %s1014_s0, %s1430_s5 }
 0x174   : > { %p1016_p6 = pnand %p1015_p4, %p1526_p9 }
 0x175   : > { %p1021_p2 = por %p1020_p5, %p1019_p0 }
 0x176   : > { %p1017_p12 = pneg %p1016_p6 }
 0x177   : > { %p1023_p10 = por %p1022_p8, %p1021_p2 }
 0x179   : > { %p1024_p11 = pnand %p1023_p10, %p1017_p12 }
 0x17b   : > { %1027 = shalt.err (!%p1024_p11)
}
 0x17c   : > { %851 = dma.vmem_to_hbm [thread:$0]  (%p1526_p9), %s1432_s1, 128, %s1430_s5, %s702_s20  }
 0x17d PF: > { %s1527_s19 = sld [smem:[#allocation16_spill]]  ;;  %s727_s24 = sand.u32 1, %s1079_s30  }
 0x17e   : > { %p1529_p3 = scmp.ge.s32.totalorder %s1107_s16, 2  ;;  %s728_s21 = scalar_lea.sflag [#allocation5], %s727_s24 }
 0x183   : > { %p1528_p1 = scmp.ne.s32.totalorder %s1527_s19, 0 }
 0x185   : > { %p861_p7 = pnand %p1529_p3, %p1528_p1 }
 0x187   : > { %1073 = dma.done.wait (!%p861_p7), %s728_s21, 128  }
 0x188   : > { %1075 = vsyncadd (!%p861_p7), %s728_s21, 4294967168  ;;  %s28_s16 = sadd.s32 1, %s1107_s16   ;;  %s1530_s28 = sld [smem:[#allocation12_spill]] }
 0x189   : > { %p25_p13 = scmp.ge.s32.totalorder %s28_s16, 4   ;;  %s1531_s11 = sld [smem:[#allocation15_spill]] }
 0x18a   : > { %s1532_s14 = sld [smem:[#allocation13_spill]]  ;;  %s1533_s15 = sld [smem:[#allocation14_spill]] }
 0x18b   : > { %s1534_s30 = smov %s1083_s10  ;;  %s1536_s12 = smov %s1095_s13 }
 0x18c   : > { %s1473_s13 = smov 0   ;;  %27 = sbr.rel (!%p25_p13) target bundleno = 16 (0x10), region = 122 }
 0x18e   : > { %s1535_s10 = smov %s1530_s28 }
 0x193   :  { %733 = vsyncpa [#allocation4], 1 }
 0x194   :  { %735 = vsyncpa [#allocation4 + $0x1], 1 }
 0x195   :  { %736 = vsyncpa [#allocation7], 1 }
 0x196   :  { %738 = vsyncpa [#allocation7 + $0x1], 1 }
 0x197   :  { %739 = vsyncpa [#allocation5], 1 }
 0x198   :  { %741 = vsyncpa [#allocation5 + $0x1], 1 }

</bundles_post_ra>
